<compile_context>
chip_gen: v7x
topology: tpu7x:2x2x1
jax: 0.10.0
libtpu: 0.0.40
codegen_flags: <defaults>
</compile_context>

<pallas_src>
import functools
import math

import jax
import jax.numpy as jnp
from jax import lax
from jax.experimental import pallas as pl
from jax.experimental.pallas import tpu as pltpu


# ---------------------------------------------------------------------------
# VMEM / tiling helpers
# ---------------------------------------------------------------------------
def _vmem_capacity_bytes():
    try:
        info = pltpu.get_tpu_info()
        cap = int(getattr(info, "vmem_capacity_bytes", 128 << 20))
    except Exception:
        cap = 128 << 20
    return cap


def _vmem_limit(bytes_estimate):
    """Double-buffered estimate + headroom, capped at ~75% of physical VMEM
    (≈48 MiB on v7x, ≈96 MiB on v5e/v6e) so Mosaic scratch still fits."""
    cap = (_vmem_capacity_bytes() * 3) // 4
    return int(min(max(2 * bytes_estimate + (1 << 20), 8 << 20), cap))


def _tile(dim, max_tile, granule):
    """Largest tile <= max_tile that divides dim and is a multiple of granule,
    falling back to the full extent (always a legal block)."""
    if dim <= max_tile or dim % granule != 0:
        return dim
    t = max_tile - (max_tile % granule)
    while t > granule and dim % t != 0:
        t -= granule
    return t if dim % t == 0 else dim


# ---------------------------------------------------------------------------
# Linear kernel: o = x @ w + b, tiled over (rows, Dout, Din)
# ---------------------------------------------------------------------------
def _linear_kernel(x_ref, w_ref, b_ref, o_ref, acc_ref):
    k = pl.program_id(2)

    @pl.when(k == 0)
    def _init():
        acc_ref[...] = jnp.zeros_like(acc_ref)

    acc_ref[...] += jnp.dot(x_ref[...], w_ref[...],
                            preferred_element_type=jnp.float32)

    @pl.when(k == pl.num_programs(2) - 1)
    def _store():
        o_ref[...] = (acc_ref[...] +
                      b_ref[...].astype(jnp.float32)).astype(o_ref.dtype)


def linear(x, w, b, *, tm_max=256, tn_max=512, tk_max=512):
    """x:(rows, Din) @ w:(Din, Dout) + b:(Dout,) -> (rows, Dout)."""
    rows, din = x.shape
    dout = w.shape[1]
    tm = _tile(rows, tm_max, 8)
    tn = _tile(dout, tn_max, 128)
    tk = _tile(din, tk_max, 128)
    b2 = b.reshape(1, dout)

    est = (x.dtype.itemsize * tm * tk + w.dtype.itemsize * tk * tn
           + 4 * tm * tn + x.dtype.itemsize * tm * tn + 4 * tn)

    return pl.pallas_call(
        _linear_kernel,
        out_shape=jax.ShapeDtypeStruct((rows, dout), x.dtype),
        grid_spec=pltpu.PrefetchScalarGridSpec(
            num_scalar_prefetch=0,
            grid=(rows // tm, dout // tn, din // tk),
            in_specs=[
                pl.BlockSpec((tm, tk), lambda i, j, k: (i, k)),
                pl.BlockSpec((tk, tn), lambda i, j, k: (k, j)),
                pl.BlockSpec((1, tn), lambda i, j, k: (0, j)),
            ],
            out_specs=pl.BlockSpec((tm, tn), lambda i, j, k: (i, j)),
            scratch_shapes=[pltpu.VMEM((tm, tn), jnp.float32)],
        ),
        compiler_params=pltpu.CompilerParams(
            dimension_semantics=("parallel", "parallel", "arbitrary"),
            vmem_limit_bytes=_vmem_limit(est)),
    )(x, w, b2)


# ---------------------------------------------------------------------------
# Attention kernel: one batch element, all heads, lane-dense output
# ---------------------------------------------------------------------------
def _attention_kernel(*refs, num_heads, head_dim, has_mask):
    if has_mask:
        qkv_ref, mask_ref, o_ref = refs
        mask = mask_ref[...].astype(jnp.float32)          # (S, S), resident
    else:
        qkv_ref, o_ref = refs

    qkv = qkv_ref[...]                                    # (S, 3*D), input dtype
    scale = 1.0 / math.sqrt(head_dim)

    head_outs = []
    for h in range(num_heads):
        # Exact PyTorch reshape(B,S,H,3hd) -> chunk(3) column layout.
        base = h * 3 * head_dim
        q = qkv[:, base: base + head_dim] * scale          # scale folded into q
        k = qkv[:, base + head_dim: base + 2 * head_dim]
        v = qkv[:, base + 2 * head_dim: base + 3 * head_dim]

        # scores = (q*scale) @ k^T, f32 accumulation on the MXU (no upcast).
        s = lax.dot_general(q, k, (((1,), (1,)), ((), ())),
                            preferred_element_type=jnp.float32)
        if has_mask:
            s = s + mask

        # Numerically stable softmax; reciprocal on the EUP slot.
        m = jnp.max(s, axis=-1, keepdims=True)
        p = jnp.exp(s - m)
        denom = jnp.sum(p, axis=-1, keepdims=True)
        attn = (p * pl.reciprocal(denom, approx=True)).astype(v.dtype)

        head_outs.append(jnp.dot(attn, v, preferred_element_type=jnp.float32))

    # Single full-width (lane-dense) store in (S, H*hd) layout.
    o_ref[...] = jnp.concatenate(head_outs, axis=-1).astype(o_ref.dtype)
    # TODO(synk): for long S, tile the key axis as an inner "arbitrary" grid
    # dimension with an online-softmax (flash) accumulator instead of the full
    # (S, S) score tile.


def attention(qkv, mask, *, num_heads, head_dim):
    """qkv:(B, S, 3*D) fused projection, mask None/(S,S)/(B,S,S) additive
    -> (B, S, D) attention output in token-major layout (no transposes)."""
    B, S, three_d = qkv.shape
    D = num_heads * head_dim
    assert three_d == 3 * D
    has_mask = mask is not None

    kernel = functools.partial(_attention_kernel, num_heads=num_heads,
                               head_dim=head_dim, has_mask=has_mask)

    in_specs = [pl.BlockSpec((None, S, three_d), lambda b: (b, 0, 0))]
    args = [qkv]
    mask_bytes = 0
    if has_mask:
        if mask.ndim == 2:
            # Same mask for every batch: pass once, stays VMEM-resident.
            in_specs.append(pl.BlockSpec((S, S), lambda b: (0, 0)))
        else:
            in_specs.append(pl.BlockSpec((None, S, S), lambda b: (b, 0, 0)))
        args.append(mask)
        mask_bytes = mask.dtype.itemsize * S * S

    est = (qkv.dtype.itemsize * S * three_d + mask_bytes
           + qkv.dtype.itemsize * S * D + 4 * 3 * S * S + 4 * S * D)

    return pl.pallas_call(
        kernel,
        out_shape=jax.ShapeDtypeStruct((B, S, D), qkv.dtype),
        grid_spec=pltpu.PrefetchScalarGridSpec(
            num_scalar_prefetch=0,
            grid=(B,),
            in_specs=in_specs,
            out_specs=pl.BlockSpec((None, S, D), lambda b: (b, 0, 0)),
        ),
        compiler_params=pltpu.CompilerParams(
            dimension_semantics=("parallel",),
            vmem_limit_bytes=_vmem_limit(est)),
    )(*args)


# ---------------------------------------------------------------------------
# Full forward (matches MultiHeadAttention.forward(x, mask))
# ---------------------------------------------------------------------------
def multi_head_attention_forward(x, mask, w_qkv, b_qkv, w_out, b_out, *,
                                 num_heads):
    B, S, D = x.shape
    H = num_heads
    assert D % H == 0, "d_model must be divisible by num_heads"
    hd = D // H

    # QKV projection over the flattened token axis.
    qkv = linear(x.reshape(B * S, D), w_qkv, b_qkv)        # (B*S, 3D)
    qkv = qkv.reshape(B, S, 3 * D)                         # free reshape, no transpose

    # Per-batch, all-heads attention; output already in (B, S, H*hd) layout.
    values = attention(qkv, mask, num_heads=H, head_dim=hd)

    out = linear(values.reshape(B * S, D), w_out, b_out)   # (B*S, D)
    return out.reshape(B, S, D)


# ---------------------------------------------------------------------------
# Pure-JAX reference (mirrors the PyTorch forward exactly)
# ---------------------------------------------------------------------------
def multi_head_attention_reference(x, mask, w_qkv, b_qkv, w_out, b_out, *,
                                   num_heads):
    B, S, D = x.shape
    H = num_heads
    hd = D // H
    qkv = x @ w_qkv + b_qkv
    qkv = qkv.reshape(B, S, H, 3 * hd).transpose(0, 2, 1, 3)
    q, k, v = jnp.split(qkv, 3, axis=-1)
    scaled = jnp.einsum("bhqd,bhkd->bhqk", q, k) / math.sqrt(hd)
    if mask is not None:
        m = mask if mask.ndim == 3 else mask[None]
        scaled = scaled + m[:, None, :, :]
    attn = jax.nn.softmax(scaled, axis=-1)
    values = jnp.einsum("bhqk,bhkd->bhqd", attn, v)
    values = values.transpose(0, 2, 1, 3).reshape(B, S, D)
    return values @ w_out + b_out


# ---------------------------------------------------------------------------
if __name__ == "__main__":
    B, S, D, H = 2, 8, 32, 4   # batch=2, seq=8, d_model=32, heads=4 (hd=8)

    key = jax.random.PRNGKey(0)
    kx, kw1, kb1, kw2, kb2 = jax.random.split(key, 5)
    x = jax.random.normal(kx, (B, S, D), jnp.float32)
    w_qkv = jax.random.normal(kw1, (D, 3 * D), jnp.float32) / math.sqrt(D)
    b_qkv = 0.02 * jax.random.normal(kb1, (3 * D,), jnp.float32)
    w_out = jax.random.normal(kw2, (D, D), jnp.float32) / math.sqrt(D)
    b_out = 0.02 * jax.random.normal(kb2, (D,), jnp.float32)

    # Causal additive mask (0 keep / -1e9 drop), shared across the batch, so it
    # is passed once as a 2-D (S, S) array and stays VMEM-resident.
    causal = jnp.where(jnp.tril(jnp.ones((S, S), dtype=bool)),
                       0.0, -1e9).astype(jnp.float32)

    out = multi_head_attention_forward(x, causal, w_qkv, b_qkv, w_out, b_out,
                                       num_heads=H)
    out = jax.block_until_ready(out)

    ref = multi_head_attention_reference(x, causal, w_qkv, b_qkv, w_out, b_out,
                                         num_heads=H)
    ref = jax.block_until_ready(ref)

    assert out.shape == (B, S, D)
    max_err = float(jnp.max(jnp.abs(out - ref)))
    assert jnp.allclose(out, ref, rtol=2e-2, atol=2e-2), max_err

    print("KERNEL_OK")
</pallas_src>

<mosaic_0001>
module attributes {stable_mosaic.version = 11 : i64} {
  func.func @_linear_kernel(%arg0: i32, %arg1: i32, %arg2: i32, %arg3: memref<16x32xf32, #tpu.memory_space<vmem>>, %arg4: memref<32x96xf32, #tpu.memory_space<vmem>>, %arg5: memref<1x96xf32, #tpu.memory_space<vmem>>, %arg6: memref<16x96xf32, #tpu.memory_space<vmem>>, %arg7: memref<16x96xf32, #tpu.memory_space<vmem>>) attributes {dimension_semantics = [#tpu.dimension_semantics<parallel>, #tpu.dimension_semantics<parallel>, #tpu.dimension_semantics<arbitrary>], iteration_bounds = array<i64: 1, 1, 1>, scalar_prefetch = 0 : i64, scratch_operands = 1 : i64, tpu.core_type = #tpu.core_type<tc>, window_params = [{transform_indices = @transform_0, window_bounds = array<i64: 16, 32>}, {transform_indices = @transform_1, window_bounds = array<i64: 32, 96>}, {transform_indices = @transform_2, window_bounds = array<i64: 1, 96>}, {transform_indices = @transform_3, window_bounds = array<i64: 16, 96>}]} {
    %c0_i32 = arith.constant 0 : i32
    %0 = arith.cmpi eq, %arg2, %c0_i32 : i32
    %1 = arith.extui %0 : i1 to i32
    %c0_i32_0 = arith.constant 0 : i32
    %2 = arith.cmpi ne, %1, %c0_i32_0 : i32
    scf.if %2 {
      %cst_10 = arith.constant 0.000000e+00 : f32
      %12 = vector.broadcast %cst_10 : f32 to vector<16x96xf32>
      %c0_11 = arith.constant 0 : index
      %c0_12 = arith.constant 0 : index
      %13 = vector.load %arg7[%c0_11, %c0_12] : memref<16x96xf32, #tpu.memory_space<vmem>>, vector<16x96xf32>
      tpu.vector_store %arg7[%c0_11, %c0_12], %12 {strides = array<i32>} : memref<16x96xf32, #tpu.memory_space<vmem>>, vector<16x96xf32>,
    } else {
    }
    %c0 = arith.constant 0 : index
    %c0_1 = arith.constant 0 : index
    %3 = vector.load %arg7[%c0, %c0_1] : memref<16x96xf32, #tpu.memory_space<vmem>>, vector<16x96xf32>
    %c0_2 = arith.constant 0 : index
    %c0_3 = arith.constant 0 : index
    %4 = vector.load %arg3[%c0_2, %c0_3] : memref<16x32xf32, #tpu.memory_space<vmem>>, vector<16x32xf32>
    %c0_4 = arith.constant 0 : index
    %c0_5 = arith.constant 0 : index
    %5 = vector.load %arg4[%c0_4, %c0_5] : memref<32x96xf32, #tpu.memory_space<vmem>>, vector<32x96xf32>
    %cst = arith.constant dense<0.000000e+00> : vector<16x96xf32>
    %6 = tpu.matmul %4, %5, %cst {dimension_numbers = #tpu.dot_dimension_numbers<[1], [0], [0], [1], [0, 0, 1, 1], [], []>} : vector<16x32xf32>, vector<32x96xf32>, vector<16x96xf32> -> vector<16x96xf32>
    %7 = arith.addf %3, %6 : vector<16x96xf32>
    %c0_6 = arith.constant 0 : index
    %c0_7 = arith.constant 0 : index
    %8 = vector.load %arg7[%c0_6, %c0_7] : memref<16x96xf32, #tpu.memory_space<vmem>>, vector<16x96xf32>
    tpu.vector_store %arg7[%c0_6, %c0_7], %7 {strides = array<i32>} : memref<16x96xf32, #tpu.memory_space<vmem>>, vector<16x96xf32>,
    %c0_i32_8 = arith.constant 0 : i32
    %9 = arith.cmpi eq, %arg2, %c0_i32_8 : i32
    %10 = arith.extui %9 : i1 to i32
    %c0_i32_9 = arith.constant 0 : i32
    %11 = arith.cmpi ne, %10, %c0_i32_9 : i32
    scf.if %11 {
      %c0_10 = arith.constant 0 : index
      %c0_11 = arith.constant 0 : index
      %12 = vector.load %arg7[%c0_10, %c0_11] : memref<16x96xf32, #tpu.memory_space<vmem>>, vector<16x96xf32>
      %c0_12 = arith.constant 0 : index
      %c0_13 = arith.constant 0 : index
      %13 = vector.load %arg5[%c0_12, %c0_13] : memref<1x96xf32, #tpu.memory_space<vmem>>, vector<1x96xf32>
      %14 = vector.broadcast %13 : vector<1x96xf32> to vector<16x96xf32>
      %15 = arith.addf %12, %14 : vector<16x96xf32>
      %c0_14 = arith.constant 0 : index
      %c0_15 = arith.constant 0 : index
      %16 = vector.load %arg6[%c0_14, %c0_15] : memref<16x96xf32, #tpu.memory_space<vmem>>, vector<16x96xf32>
      tpu.vector_store %arg6[%c0_14, %c0_15], %15 {strides = array<i32>} : memref<16x96xf32, #tpu.memory_space<vmem>>, vector<16x96xf32>,
    } else {
    }
    return
  }
  func.func @transform_0(%arg0: i32, %arg1: i32, %arg2: i32) -> (i32, i32) {
    %c0_i32 = arith.constant 0 : i32
    return %arg0, %arg2 : i32, i32
  }
  func.func @transform_1(%arg0: i32, %arg1: i32, %arg2: i32) -> (i32, i32) {
    %c0_i32 = arith.constant 0 : i32
    return %arg2, %arg1 : i32, i32
  }
  func.func @transform_2(%arg0: i32, %arg1: i32, %arg2: i32) -> (i32, i32) {
    %c0_i32 = arith.constant 0 : i32
    %c0_i32_0 = arith.constant 0 : i32
    return %c0_i32, %arg1 : i32, i32
  }
  func.func @transform_3(%arg0: i32, %arg1: i32, %arg2: i32) -> (i32, i32) {
    %c0_i32 = arith.constant 0 : i32
    return %arg0, %arg1 : i32, i32
  }
}

</mosaic_0001>

<bundles_post_ra>
// kernel: tpu_custom_call.1
= control target key start
LH: loop header
LB: loop body
LE: loop exit
PB: predicated region body
PF: predicated region fallthrough
CT: control target
= control target key end

     0   :  { %8 = vsyncpa [#allocation4], 0  ;;  %s365_s0 = inlined_call_operand.hbm [shape: f32[16,32], index: 0, kind: input, shape index: {}]   ;;  %s366_s1 = inlined_call_operand.hbm [shape: f32[32,96], index: 1, kind: input, shape index: {}]   ;;  %s367_s2 = inlined_call_operand.vmem [shape: f32[1,96], index: 2, kind: input, shape index: {}]   ;;  %s368_s3 = inlined_call_operand.hbm [shape: f32[16,96], index: 3, kind: output, shape index: {}]  }
   0x1   :  { %9 = vsyncpa [#allocation7], 0 }
   0x2   :  { %10 = vsyncpa [#allocation5], 0  ;;  %s285_s12 = smov [#allocation3]   ;;  %s213_s16 = scalar_lea.hbm %s365_s0, 256 }
   0x3   :  { %s16_s13 = sshll.u32 %s285_s12, 4  ;;  %p214_p0 = scmp.ne.s32.totalorder %s365_s0, %s213_s16  ;;  %s17_s13 = int_to_ptr.vmem [resolvable:$true] %s16_s13 }
   0x4   :  { %p217_p1 = scmp.lt.u32.totalorder %s213_s16, %s365_s0 }
   0x6   :  { %p219_p2 = pnand %p217_p1, %p214_p0 }
   0x8   :  { %222 = shalt.err (!%p219_p2)
}
   0x9   :  { %s223_s21 = scalar_lea.vmem %s17_s13, 256  ;;  %p228_p4 = scmp.lt.s32.totalorder %s17_s13, %s17_s13 }
   0xa   :  { %p224_p3 = scmp.ne.s32.totalorder %s17_s13, %s223_s21  ;;  %p229_p5 = scmp.lt.s32.totalorder %s223_s21, %s223_s21 }
   0xc   :  { %p230_p6 = por %p229_p5, %p228_p4 }
   0xe   :  { %p231_p7 = pnand %p230_p6, %p224_p3 }
  0x10   :  { %234 = shalt.err (!%p231_p7)
}
  0x11   :  { %s286_s22 = smov 128   ;;  %s287_s23 = smov 8  }
  0x12   :  { %22 = dma.hbm_to_vmem [thread:$0]  %s365_s0, 256, %s17_s13, [#allocation4], %s286_s22, %s286_s22, %s287_s23  }
  0x13   :  { %s288_s26 = smov [#allocation6]   ;;  %s235_s30 = scalar_lea.hbm %s366_s1, 512 }
  0x14   :  { %s28_s27 = sshll.u32 %s288_s26, 4  ;;  %p236_p8 = scmp.ne.s32.totalorder %s366_s1, %s235_s30  ;;  %s29_s27 = int_to_ptr.vmem [resolvable:$true] %s28_s27 }
  0x15   :  { %p239_p9 = scmp.lt.u32.totalorder %s235_s30, %s366_s1 }
  0x17   :  { %p241_p10 = pnand %p239_p9, %p236_p8 }
  0x19   :  { %244 = shalt.err (!%p241_p10)
}
  0x1a   :  { %s245_s8 = scalar_lea.vmem %s29_s27, 512  ;;  %p250_p12 = scmp.lt.s32.totalorder %s29_s27, %s29_s27 }
  0x1b   :  { %p246_p11 = scmp.ne.s32.totalorder %s29_s27, %s245_s8  ;;  %p251_p13 = scmp.lt.s32.totalorder %s245_s8, %s245_s8 }
  0x1d   :  { %p252_p0 = por %p251_p13, %p250_p12 }
  0x1f   :  { %p253_p1 = pnand %p252_p0, %p246_p11 }
  0x21   :  { %256 = shalt.err (!%p253_p1)
}
  0x22   :  { %34 = dma.hbm_to_vmem [thread:$0]  %s366_s1, 512, %s29_s27, [#allocation7], %s286_s22, %s286_s22, %s287_s23  }
  0x23   :  { %279 = dma.done.wait [#allocation4], 256  }
  0x24   :  { %280 = vsyncadd [#allocation4], 4294967040 }
  0x25   :  { %281 = dma.done.wait [#allocation7], 512  }
  0x26   :  { %282 = vsyncadd [#allocation7], 4294966784  ;;  %vm47_vm0 = vcmask 785408   ;;  %v289_v0 = vmov 0.0   ;;  %vm58_vm1 = vcmask 261120   ;;  %v54_v1 = vld [vmem:[#allocation6] sm:$0xff] }
  0x27   :  { %49 = vst.msk [vmem:[#allocation2 + $0x8] sm:$0xff] %vm47_vm0, %v289_v0  ;;  %48 = vst.msk [vmem:[#allocation2] sm:$0xff] %vm47_vm0, %v289_v0  ;;  %v55_v2 = vld [vmem:[#allocation6 + $0x8] sm:$0xff]  ;;  %v56_v3 = vld [vmem:[#allocation6 + $0x10] sm:$0xff]  ;;  %s290_s11 = smov [#allocation8]  }
  0x28   :  { %v199_v4 = vpack.c.bf16 %v55_v2, %v54_v1  ;;  %v57_v5 = vld [vmem:[#allocation6 + $0x18] sm:$0xff]  ;;  %v52_v6 = vld [vmem:[#allocation3] sm:$0xff]  ;;  %v181_v15 = vld [vmem:[%s367_s2] ss:$0 sm:$0xff]  ;;  %s166_s12 = sshll.u32 %s290_s11, 4  ;;  %s167_s12 = int_to_ptr.vmem [resolvable:$true] %s166_s12 }
  0x29   :  { %v203_v7 = vpack.c.bf16 %v57_v5, %v56_v3  ;;  %196 = vmatprep.mubr.msk.f32.mxu0 %vm58_vm1, %v52_v6  ;;  %v53_v8 = vld [vmem:[#allocation3 + $0x8] sm:$0xff]  ;;  %s257_s13 = scalar_lea.vmem %s167_s12, 256  ;;  %p262_p3 = scmp.lt.s32.totalorder %s167_s12, %s167_s12 }
  0x2a   :  { %200 = vmatprep.subr.bf16.mxu0 %v199_v4  ;;  %p258_p2 = scmp.ne.s32.totalorder %s167_s12, %s257_s13  ;;  %p263_p4 = scmp.lt.s32.totalorder %s257_s13, %s257_s13 }
  0x2b   :  { %202 = vmatpush3.bf16.msra.mxu0 %v199_v4 }
  0x2c   :  { %204 = vmatprep.subr.bf16.mxu0 %v203_v7  ;;  %p264_p5 = por %p263_p4, %p262_p3 }
  0x2e   :  { %v51_v9 = vld [vmem:[#allocation2 + $0x8] sm:$0xff]  ;;  %v50_v10 = vld [vmem:[#allocation2] sm:$0xff]  ;;  %p265_p6 = pnand %p264_p5, %p258_p2 }
  0x2f   :  { %206 = vmatpush3.bf16.msra.mxu0 %v203_v7 }
  0x32   :  { %197 = vmatmul.mubr.msk.f32.vlgmr.msra.gmra.mrb[0].mxu0 %vm58_vm1, %v53_v8 }
 0x105   :  { %v198_v11 = vpop.f32.mrb[0].mxu0 }
 0x106   :  { %v141_v12 = vadd.f32 %v198_v11, %v51_v9  ;;  %v131_v13 = vpop.f32.mrb[1].mxu0 }
 0x107   :  { %v140_v14 = vadd.f32 %v131_v13, %v50_v10 }
 0x108   :  { %144 = vst.msk [vmem:[#allocation2 + $0x8] sm:$0xff] %vm47_vm0, %v141_v12 }
 0x109   :  { %143 = vst.msk [vmem:[#allocation2] sm:$0xff] %vm47_vm0, %v140_v14 }
 0x10f   :  { %v149_v16 = vld [vmem:[#allocation2 + $0x8] sm:$0xff] }
 0x110   :  { %v148_v17 = vld [vmem:[#allocation2] sm:$0xff]  ;;  %v158_v18 = vadd.f32 %v181_v15, %v149_v16 }
 0x111   :  { %v157_v19 = vadd.f32 %v181_v15, %v148_v17 }
 0x112   :  { %160 = vst.msk [vmem:[#allocation8 + $0x8] sm:$0xff] %vm47_vm0, %v158_v18 }
 0x113   :  { %159 = vst.msk [vmem:[#allocation8] sm:$0xff] %vm47_vm0, %v157_v19 }
 0x114   :  { %268 = shalt.err (!%p265_p6)
}
 0x115   :  { %s269_s15 = scalar_lea.hbm %s368_s3, 256 }
 0x116   :  { %p270_p7 = scmp.ne.s32.totalorder %s368_s3, %s269_s15  ;;  %p273_p8 = scmp.lt.u32.totalorder %s269_s15, %s368_s3 }
 0x118   :  { %p275_p9 = pnand %p273_p8, %p270_p7 }
 0x11a   :  { %278 = shalt.err (!%p275_p9)
}
 0x11b   :  { %172 = dma.vmem_to_hbm [thread:$0]  %s167_s12, 256, %s368_s3, [#allocation5], %s286_s22, %s286_s22, %s287_s23  }
 0x11c   :  { %283 = dma.done.wait [#allocation5], 256  }
 0x11d   :  { %284 = vsyncadd [#allocation5], 4294967040 }
 0x11e   :  { %176 = vsyncpa [#allocation4], 1 }
 0x11f   :  { %177 = vsyncpa [#allocation7], 1 }
 0x120   :  { %178 = vsyncpa [#allocation5], 1 }

</bundles_post_ra>
